<compile_context>
chip_gen: v6e
topology: v6e:2x2x1
jax: 0.10.0
libtpu: 0.0.40
codegen_flags: <defaults>
</compile_context>

<pallas_src>
import jax
import jax.numpy as jnp
from jax.experimental import pallas as pl
from jax.experimental.pallas import tpu as pltpu


def _round_up(a, b):
    return (a + b - 1) // b * b


def _moe_ffn_kernel(x_ref, rw_ref, w1_ref, w3_ref, w2_ref, out_ref, acc_ref):
    """One (token-tile, expert, hidden-tile) step of the weighted expert FFN."""
    e = pl.program_id(1)
    h = pl.program_id(2)
    n_e = pl.num_programs(1)
    n_h = pl.num_programs(2)

    @pl.when(jnp.logical_and(e == 0, h == 0))
    def _():
        acc_ref[...] = jnp.zeros_like(acc_ref)

    x = x_ref[...]                                                    # (tT, D)
    h1 = jnp.dot(x, w1_ref[...], preferred_element_type=jnp.float32)  # (tT, tH)
    h3 = jnp.dot(x, w3_ref[...], preferred_element_type=jnp.float32)  # (tT, tH)
    g = (h1 * jax.nn.sigmoid(h1)) * h3                                # silu(h1)*h3, f32
    rw = rw_ref[...].astype(jnp.float32)                              # (tT, 1)

    tH = w1_ref.shape[-1]
    D = out_ref.shape[-1]
    if tH <= D:
        # Fold the per-token routing weight into the smaller (tT, tH) activation.
        y = jnp.dot((g * rw).astype(x.dtype), w2_ref[...],
                    preferred_element_type=jnp.float32)               # (tT, D)
        acc_ref[...] += y
    else:
        y = jnp.dot(g.astype(x.dtype), w2_ref[...],
                    preferred_element_type=jnp.float32)               # (tT, D)
        acc_ref[...] += rw * y

    @pl.when(jnp.logical_and(e == n_e - 1, h == n_h - 1))
    def _():
        out_ref[...] = acc_ref[...].astype(out_ref.dtype)


def _pick_tiles(T, D, H, cdt_size, out_size, token_tile, hidden_tile,
                budget_bytes=28 * 1024 * 1024):
    """Pick (tT, tH) so double-buffered working set fits the default VMEM limit."""
    if token_tile is not None:
        tT = max(8, token_tile - (token_tile % 8))
    else:
        tT = min(_round_up(T, 8), 256)

    if hidden_tile is not None:
        tH = hidden_tile if hidden_tile % 128 == 0 else H  # full-dim block always legal
        return tT, tH

    if H < 128:
        return tT, H

    # Fixed per-step VMEM: x + out (double-buffered) + f32 accumulator.
    fixed = tT * D * (2 * cdt_size + 2 * out_size + 4)
    max_tH = min(_round_up(H, 128), 1024)
    tH = 128
    for cand in range(max_tH, 127, -128):
        wbytes = 2 * 3 * D * cand * cdt_size  # w1 + w3 + w2, double-buffered
        if fixed + wbytes <= budget_bytes:
            tH = cand
            break
    return tT, tH


def moe_forward(x, gate_w, w1, w3, w2, *, top_k,
                token_tile=None, hidden_tile=None,
                compute_dtype=None, vmem_limit_bytes=None):
    """MoeLayer.forward: x of shape (..., D) -> same shape."""
    orig_shape = x.shape
    D = x.shape[-1]
    xt = x.reshape(-1, D)
    T = xt.shape[0]
    E, Dw, H = w1.shape
    assert Dw == D
    out_dtype = x.dtype
    cdt = compute_dtype if compute_dtype is not None else x.dtype
    cdt_size = jnp.dtype(cdt).itemsize
    out_size = jnp.dtype(out_dtype).itemsize

    # ---- gating: gate matmul + top-k softmax (pure JAX, negligible cost) ----
    # TODO(synk): torch.topk tie-breaking order is not reproduced exactly
    # (ties are measure-zero for random float inputs).
    logits = jnp.dot(xt.astype(jnp.float32), gate_w.astype(jnp.float32))   # (T, E)
    vals, idx = jax.lax.top_k(logits, top_k)
    topw = jax.nn.softmax(vals, axis=-1)                                   # (T, K)
    # Dense routing weights: softmax weight where selected, exactly 0 elsewhere.
    rw = jnp.einsum("tk,tke->te", topw,
                    jax.nn.one_hot(idx, E, dtype=jnp.float32))             # (T, E)
    rw_et = jnp.transpose(rw)[:, :, None]                                  # (E, T, 1)

    # ---- tile selection ----
    tT, tH = _pick_tiles(T, D, H, cdt_size, out_size, token_tile, hidden_tile)

    Tpad = _round_up(T, tT)
    Hpad = _round_up(H, tH)

    if Tpad != T:
        xt = jnp.pad(xt, ((0, Tpad - T), (0, 0)))
        rw_et = jnp.pad(rw_et, ((0, 0), (0, Tpad - T), (0, 0)))  # padded tokens: weight 0
    if Hpad != H:
        w1 = jnp.pad(w1, ((0, 0), (0, 0), (0, Hpad - H)))
        w3 = jnp.pad(w3, ((0, 0), (0, 0), (0, Hpad - H)))
        w2 = jnp.pad(w2, ((0, 0), (0, Hpad - H), (0, 0)))

    xt = xt.astype(cdt)
    w1 = w1.astype(cdt)
    w3 = w3.astype(cdt)
    w2 = w2.astype(cdt)
    rw_et = rw_et.astype(jnp.float32)

    grid = (Tpad // tT, E, Hpad // tH)

    cp_kwargs = dict(dimension_semantics=("parallel", "arbitrary", "arbitrary"))
    if vmem_limit_bytes is not None:
        cp_kwargs["vmem_limit_bytes"] = vmem_limit_bytes

    # Advisory cost hint for XLA's scheduler.
    cost = pl.CostEstimate(
        flops=6 * Tpad * D * Hpad * E,
        transcendentals=Tpad * Hpad * E,
        bytes_accessed=((Tpad // tT) * 3 * D * Hpad * E * cdt_size
                        + Tpad * D * cdt_size + Tpad * D * out_size),
    )

    out = pl.pallas_call(
        _moe_ffn_kernel,
        out_shape=jax.ShapeDtypeStruct((Tpad, D), out_dtype),
        grid_spec=pltpu.PrefetchScalarGridSpec(
            num_scalar_prefetch=0,
            grid=grid,
            in_specs=[
                # x: token tile, resident across (e, h)
                pl.BlockSpec((tT, D), lambda t, e, h: (t, 0)),
                # routing weight column for expert e, token tile t
                pl.BlockSpec((pl.Squeezed(), tT, 1), lambda t, e, h: (e, t, 0)),
                # per-expert, per-H-tile weight slabs (the dominant DMA stream)
                pl.BlockSpec((pl.Squeezed(), D, tH), lambda t, e, h: (e, 0, h)),
                pl.BlockSpec((pl.Squeezed(), D, tH), lambda t, e, h: (e, 0, h)),
                pl.BlockSpec((pl.Squeezed(), tH, D), lambda t, e, h: (e, h, 0)),
            ],
            out_specs=pl.BlockSpec((tT, D), lambda t, e, h: (t, 0)),
            scratch_shapes=[pltpu.VMEM((tT, D), jnp.float32)],  # f32 accumulator
        ),
        compiler_params=pltpu.CompilerParams(**cp_kwargs),
        cost_estimate=cost,
    )(xt, rw_et, w1, w3, w2)

    return out[:T].reshape(orig_shape)


def moe_reference(x, gate_w, w1, w3, w2, *, top_k):
    """Pure-JAX reference mirroring the PyTorch MoeLayer.forward."""
    orig_shape = x.shape
    xt = x.reshape(-1, x.shape[-1])
    logits = xt @ gate_w
    vals, idx = jax.lax.top_k(logits, top_k)
    w = jax.nn.softmax(vals.astype(jnp.float32), axis=-1).astype(xt.dtype)
    out = jnp.zeros_like(xt)
    for e in range(w1.shape[0]):
        y = (jax.nn.silu(xt @ w1[e]) * (xt @ w3[e])) @ w2[e]
        we = jnp.sum(jnp.where(idx == e, w, 0.0), axis=-1, keepdims=True)
        out = out + we * y
    return out.reshape(orig_shape)


if __name__ == "__main__":
    # MoeArgs(num_experts=8, num_experts_per_tok=2), small Mixtral-like dims.
    B, S, D, H, E, K = 2, 8, 128, 256, 8, 2

    key = jax.random.PRNGKey(0)
    kx, kg, k1, k3, k2 = jax.random.split(key, 5)
    x = jax.random.normal(kx, (B, S, D), dtype=jnp.float32)
    gate_w = 0.05 * jax.random.normal(kg, (D, E), dtype=jnp.float32)
    w1 = 0.05 * jax.random.normal(k1, (E, D, H), dtype=jnp.float32)
    w3 = 0.05 * jax.random.normal(k3, (E, D, H), dtype=jnp.float32)
    w2 = 0.05 * jax.random.normal(k2, (E, H, D), dtype=jnp.float32)

    ref = moe_reference(x, gate_w, w1, w3, w2, top_k=K)

    # Explicit small tiles to exercise token / expert / hidden grid axes.
    out = moe_forward(x, gate_w, w1, w3, w2, top_k=K, token_tile=8, hidden_tile=128)
    jax.block_until_ready(out)
    assert out.shape == x.shape
    assert jnp.allclose(out, ref, atol=1e-4, rtol=1e-4), "mismatch vs reference (tiled)"

    # Default tile-selection path.
    out2 = moe_forward(x, gate_w, w1, w3, w2, top_k=K)
    jax.block_until_ready(out2)
    assert jnp.allclose(out2, ref, atol=1e-4, rtol=1e-4), "mismatch vs reference (default)"

    # Non-multiple token count exercises the padding path.
    x3 = x[:, :7, :]
    ref3 = moe_reference(x3, gate_w, w1, w3, w2, top_k=K)
    out3 = moe_forward(x3, gate_w, w1, w3, w2, top_k=K)
    jax.block_until_ready(out3)
    assert jnp.allclose(out3, ref3, atol=1e-4, rtol=1e-4), "mismatch vs reference (padded)"

    print("KERNEL_OK")
</pallas_src>

<mosaic_0001>
module attributes {stable_mosaic.version = 11 : i64} {
  func.func @_moe_ffn_kernel(%arg0: i32, %arg1: i32, %arg2: i32, %arg3: memref<8x128xf32, #tpu.memory_space<vmem>>, %arg4: memref<1x8x1xf32, #tpu.memory_space<vmem>>, %arg5: memref<1x128x128xf32, #tpu.memory_space<vmem>>, %arg6: memref<1x128x128xf32, #tpu.memory_space<vmem>>, %arg7: memref<1x128x128xf32, #tpu.memory_space<vmem>>, %arg8: memref<8x128xf32, #tpu.memory_space<vmem>>, %arg9: memref<8x128xf32, #tpu.memory_space<vmem>>) attributes {dimension_semantics = [#tpu.dimension_semantics<parallel>, #tpu.dimension_semantics<arbitrary>, #tpu.dimension_semantics<arbitrary>], iteration_bounds = array<i64: 2, 8, 2>, scalar_prefetch = 0 : i64, scratch_operands = 1 : i64, tpu.core_type = #tpu.core_type<tc>, window_params = [{transform_indices = @transform_0, window_bounds = array<i64: 8, 128>}, {transform_indices = @transform_1, window_bounds = array<i64: 1, 8, 1>}, {transform_indices = @transform_2, window_bounds = array<i64: 1, 128, 128>}, {transform_indices = @transform_3, window_bounds = array<i64: 1, 128, 128>}, {transform_indices = @transform_4, window_bounds = array<i64: 1, 128, 128>}, {transform_indices = @transform_5, window_bounds = array<i64: 8, 128>}]} {
    %c0_i32 = arith.constant 0 : i32
    %0 = arith.cmpi eq, %arg1, %c0_i32 : i32
    %c0_i32_0 = arith.constant 0 : i32
    %1 = arith.cmpi eq, %arg2, %c0_i32_0 : i32
    %2 = arith.andi %0, %1 : i1
    %3 = arith.extui %2 : i1 to i32
    %c0_i32_1 = arith.constant 0 : i32
    %4 = arith.cmpi ne, %3, %c0_i32_1 : i32
    scf.if %4 {
      %cst_23 = arith.constant 0.000000e+00 : f32
      %34 = vector.broadcast %cst_23 : f32 to vector<8x128xf32>
      %c0_24 = arith.constant 0 : index
      %c0_25 = arith.constant 0 : index
      %35 = vector.load %arg9[%c0_24, %c0_25] : memref<8x128xf32, #tpu.memory_space<vmem>>, vector<8x128xf32>
      tpu.vector_store %arg9[%c0_24, %c0_25], %34 {strides = array<i32>} : memref<8x128xf32, #tpu.memory_space<vmem>>, vector<8x128xf32>,
    } else {
    }
    %c0 = arith.constant 0 : index
    %c0_2 = arith.constant 0 : index
    %5 = vector.load %arg3[%c0, %c0_2] : memref<8x128xf32, #tpu.memory_space<vmem>>, vector<8x128xf32>
    %c0_3 = arith.constant 0 : index
    %c0_4 = arith.constant 0 : index
    %c0_5 = arith.constant 0 : index
    %6 = vector.load %arg5[%c0_3, %c0_4, %c0_5] : memref<1x128x128xf32, #tpu.memory_space<vmem>>, vector<1x128x128xf32>
    %7 = vector.shape_cast %6 : vector<1x128x128xf32> to vector<128x128xf32>
    %cst = arith.constant dense<0.000000e+00> : vector<8x128xf32>
    %8 = tpu.matmul %5, %7, %cst {dimension_numbers = #tpu.dot_dimension_numbers<[1], [0], [0], [1], [0, 0, 1, 1], [], []>} : vector<8x128xf32>, vector<128x128xf32>, vector<8x128xf32> -> vector<8x128xf32>
    %c0_6 = arith.constant 0 : index
    %c0_7 = arith.constant 0 : index
    %c0_8 = arith.constant 0 : index
    %9 = vector.load %arg6[%c0_6, %c0_7, %c0_8] : memref<1x128x128xf32, #tpu.memory_space<vmem>>, vector<1x128x128xf32>
    %10 = vector.shape_cast %9 : vector<1x128x128xf32> to vector<128x128xf32>
    %cst_9 = arith.constant dense<0.000000e+00> : vector<8x128xf32>
    %11 = tpu.matmul %5, %10, %cst_9 {dimension_numbers = #tpu.dot_dimension_numbers<[1], [0], [0], [1], [0, 0, 1, 1], [], []>} : vector<8x128xf32>, vector<128x128xf32>, vector<8x128xf32> -> vector<8x128xf32>
    %12 = arith.negf %8 : vector<8x128xf32>
    %13 = math.exp %12 : vector<8x128xf32>
    %cst_10 = arith.constant 1.000000e+00 : f32
    %14 = vector.broadcast %cst_10 : f32 to vector<8x128xf32>
    %15 = arith.addf %14, %13 : vector<8x128xf32>
    %16 = arith.divf %14, %15 : vector<8x128xf32>
    %17 = arith.mulf %8, %16 : vector<8x128xf32>
    %18 = arith.mulf %17, %11 : vector<8x128xf32>
    %c0_11 = arith.constant 0 : index
    %c0_12 = arith.constant 0 : index
    %c0_13 = arith.constant 0 : index
    %19 = vector.load %arg4[%c0_11, %c0_12, %c0_13] : memref<1x8x1xf32, #tpu.memory_space<vmem>>, vector<1x8x1xf32>
    %20 = vector.shape_cast %19 : vector<1x8x1xf32> to vector<8x1xf32>
    %21 = vector.broadcast %20 : vector<8x1xf32> to vector<8x128xf32>
    %22 = arith.mulf %18, %21 : vector<8x128xf32>
    %c0_14 = arith.constant 0 : index
    %c0_15 = arith.constant 0 : index
    %c0_16 = arith.constant 0 : index
    %23 = vector.load %arg7[%c0_14, %c0_15, %c0_16] : memref<1x128x128xf32, #tpu.memory_space<vmem>>, vector<1x128x128xf32>
    %24 = vector.shape_cast %23 : vector<1x128x128xf32> to vector<128x128xf32>
    %cst_17 = arith.constant dense<0.000000e+00> : vector<8x128xf32>
    %25 = tpu.matmul %22, %24, %cst_17 {dimension_numbers = #tpu.dot_dimension_numbers<[1], [0], [0], [1], [0, 0, 1, 1], [], []>} : vector<8x128xf32>, vector<128x128xf32>, vector<8x128xf32> -> vector<8x128xf32>
    %c0_18 = arith.constant 0 : index
    %c0_19 = arith.constant 0 : index
    %26 = vector.load %arg9[%c0_18, %c0_19] : memref<8x128xf32, #tpu.memory_space<vmem>>, vector<8x128xf32>
    %27 = arith.addf %26, %25 : vector<8x128xf32>
    %c0_20 = arith.constant 0 : index
    %c0_21 = arith.constant 0 : index
    %28 = vector.load %arg9[%c0_20, %c0_21] : memref<8x128xf32, #tpu.memory_space<vmem>>, vector<8x128xf32>
    tpu.vector_store %arg9[%c0_20, %c0_21], %27 {strides = array<i32>} : memref<8x128xf32, #tpu.memory_space<vmem>>, vector<8x128xf32>,
    %c7_i32 = arith.constant 7 : i32
    %29 = arith.cmpi eq, %arg1, %c7_i32 : i32
    %c1_i32 = arith.constant 1 : i32
    %30 = arith.cmpi eq, %arg2, %c1_i32 : i32
    %31 = arith.andi %29, %30 : i1
    %32 = arith.extui %31 : i1 to i32
    %c0_i32_22 = arith.constant 0 : i32
    %33 = arith.cmpi ne, %32, %c0_i32_22 : i32
    scf.if %33 {
      %c0_23 = arith.constant 0 : index
      %c0_24 = arith.constant 0 : index
      %34 = vector.load %arg9[%c0_23, %c0_24] : memref<8x128xf32, #tpu.memory_space<vmem>>, vector<8x128xf32>
      %c0_25 = arith.constant 0 : index
      %c0_26 = arith.constant 0 : index
      %35 = vector.load %arg8[%c0_25, %c0_26] : memref<8x128xf32, #tpu.memory_space<vmem>>, vector<8x128xf32>
      tpu.vector_store %arg8[%c0_25, %c0_26], %34 {strides = array<i32>} : memref<8x128xf32, #tpu.memory_space<vmem>>, vector<8x128xf32>,
    } else {
    }
    return
  }
  func.func @transform_0(%arg0: i32, %arg1: i32, %arg2: i32) -> (i32, i32) {
    %c0_i32 = arith.constant 0 : i32
    %c0_i32_0 = arith.constant 0 : i32
    return %arg0, %c0_i32 : i32, i32
  }
  func.func @transform_1(%arg0: i32, %arg1: i32, %arg2: i32) -> (i32, i32, i32) {
    %c0_i32 = arith.constant 0 : i32
    %c0_i32_0 = arith.constant 0 : i32
    return %arg1, %arg0, %c0_i32 : i32, i32, i32
  }
  func.func @transform_2(%arg0: i32, %arg1: i32, %arg2: i32) -> (i32, i32, i32) {
    %c0_i32 = arith.constant 0 : i32
    %c0_i32_0 = arith.constant 0 : i32
    return %arg1, %c0_i32, %arg2 : i32, i32, i32
  }
  func.func @transform_3(%arg0: i32, %arg1: i32, %arg2: i32) -> (i32, i32, i32) {
    %c0_i32 = arith.constant 0 : i32
    %c0_i32_0 = arith.constant 0 : i32
    return %arg1, %c0_i32, %arg2 : i32, i32, i32
  }
  func.func @transform_4(%arg0: i32, %arg1: i32, %arg2: i32) -> (i32, i32, i32) {
    %c0_i32 = arith.constant 0 : i32
    %c0_i32_0 = arith.constant 0 : i32
    return %arg1, %arg2, %c0_i32 : i32, i32, i32
  }
  func.func @transform_5(%arg0: i32, %arg1: i32, %arg2: i32) -> (i32, i32) {
    %c0_i32 = arith.constant 0 : i32
    %c0_i32_0 = arith.constant 0 : i32
    return %arg0, %c0_i32 : i32, i32
  }
}

</mosaic_0001>

<bundles_post_ra>
// kernel: tpu_custom_call.1
= control target key start
LH: loop header
LB: loop body
LE: loop exit
PB: predicated region body
PF: predicated region fallthrough
CT: control target
= control target key end

     0   :  { %s1880_s0 = inlined_call_operand.vmem [shape: f32[16,128], index: 0, kind: input, shape index: {}]   ;;  %s1881_s1 = inlined_call_operand.vmem [shape: f32[8,16,1], index: 1, kind: input, shape index: {}]   ;;  %s1882_s2 = inlined_call_operand.hbm [shape: f32[8,128,256], index: 2, kind: input, shape index: {}]   ;;  %s1883_s3 = inlined_call_operand.hbm [shape: f32[8,128,256], index: 3, kind: input, shape index: {}]   ;;  %s1884_s4 = inlined_call_operand.hbm [shape: f32[8,256,128], index: 4, kind: input, shape index: {}]   ;;  %s1885_s5 = inlined_call_operand.hbm [shape: f32[16,128], index: 5, kind: output, shape index: {}]  }
   0x1   :  { %1900 = sst [smem:[#allocation26_spill]] %s1880_s0 }
   0x2   :  { %1901 = sst [smem:[#allocation27_spill]] %s1881_s1 }
   0x3   :  { %1902 = sst [smem:[#allocation28_spill]] %s1882_s2 }
   0x4   :  { %1903 = sst [smem:[#allocation29_spill]] %s1883_s3 }
   0x5   :  { %1904 = sst [smem:[#allocation30_spill]] %s1885_s5 }
   0x6   :  { %10 = vsyncpa [#allocation4], 0 }
   0x7   :  { %12 = vsyncpa [#allocation4 + $0x1], 0 }
   0x8   :  { %13 = vsyncpa [#allocation7], 0 }
   0x9   :  { %15 = vsyncpa [#allocation7 + $0x1], 0 }
   0xa   :  { %16 = vsyncpa [#allocation5], 0 }
   0xb   :  { %18 = vsyncpa [#allocation5 + $0x1], 0  ;;  %s1461_s18 = smov 0   ;;  %s1463_s19 = smov 0  }
   0xc   :  { %s1465_s20 = smov 0   ;;  %s1467_s21 = smov 0  }
   0xd   :  { %s1469_s22 = smov 0   ;;  %s1471_s23 = smov 0  }
   0xe   :  { %s1473_s24 = smov 0   ;;  %s1475_s25 = smov 0  }
   0xf   :  { %s1477_s26 = smov 0   ;;  %s1479_s27 = smov 0  }
  0x10   :  { %s1481_s28 = smov 0   ;;  %s1483_s29 = smov 0  }
  0x11   :  { %s1485_s30 = smov 0  }
  0x12 LB: > { %1905 = sst [smem:[#allocation13_spill]] %s1370_s18  ;;  %s1527_s6 = sadd.s32 4294967295, %s1418_s30   ;;  %s1418_s30 = sphi %s1485_s30, %s24_s30   ;;  %s1414_s29 = sphi %s1483_s29, %s1947_s29   ;;  %s1410_s28 = sphi %s1481_s28, %s1955_s28   ;;  %s1406_s27 = sphi %s1479_s27, %s1954_s27   ;;  %s1402_s26 = sphi %s1477_s26, %s1944_s26   ;;  %s1398_s25 = sphi %s1475_s25, %s1953_s25   ;;  %s1394_s24 = sphi %s1473_s24, %s1943_s24   ;;  %s1390_s23 = sphi %s1471_s23, %s1952_s23   ;;  %s1386_s22 = sphi %s1469_s22, %s1951_s22   ;;  %s1382_s21 = sphi %s1467_s21, %s1950_s21   ;;  %s1378_s20 = sphi %s1465_s20, %s1941_s20   ;;  %s1374_s19 = sphi %s1463_s19, %s1949_s19   ;;  %s1370_s18 = sphi %s1461_s18, %s1948_s18  }
  0x13   : > { %1906 = sst [smem:[#allocation14_spill]] %s1378_s20  ;;  %s36_s8 = sadd.s32 1, %s1406_s27 }
  0x14   : > { %1907 = sst [smem:[#allocation15_spill]] %s1394_s24  ;;  %s39_s9 = sadd.s32 1, %s1410_s28 }
  0x15   : > { %1908 = sst [smem:[#allocation16_spill]] %s1398_s25  ;;  %p37_p0 = scmp.ge.s32.totalorder %s36_s8, 2 }
  0x16   : > { %1909 = sst [smem:[#allocation17_spill]] %s1406_s27  ;;  %s43_s10 = sadd.s32 1, %s1414_s29 }
  0x17   : > { %1910 = sst [smem:[#allocation18_spill]] %s1414_s29  ;;  %s106_s11 = sadd.s32 1, %s1390_s23 }
  0x18   : > { %p113_p1 = scmp.ne.s32.totalorder %s1390_s23, %s1386_s22  ;;  %s1957_s8 = smov (%p37_p0, %s36_s8), 0 }
  0x19   : > { %1911 = sst [smem:[#allocation19_spill]] %s1957_s8  ;;  %s1959_s9 = smov (!%p37_p0, %s39_s9), %s1410_s28 }
  0x1a   : > { %s102_s12 = ssub.s32 %s1406_s27, %s1957_s8  ;;  %p114_p2 = scmp.eq.s32.totalorder %s1418_s30, 0 }
  0x1b   : > { %p41_p3 = scmp.ge.s32.totalorder %s1959_s9, 8  ;;  %p119_p4 = scmp.ne.s32.totalorder %s1386_s22, %s1382_s21 }
  0x1c   : > { %p1544_p5 = por %p114_p2, %p113_p1  ;;  %p120_p6 = scmp.eq.s32.totalorder %s1527_s6, 0 }
  0x1d   : > { %s1961_s9 = smov (%p41_p3, %s1959_s9), 0  ;;  %s1963_s10 = smov (!%p41_p3, %s43_s10), %s1414_s29 }
  0x1e   : > { %1913 = sst [smem:[#allocation20_spill]] %s1961_s9  ;;  %s101_s14 = ssub.s32 %s1410_s28, %s1961_s9 }
  0x1f   : > { %p1554_p7 = por %p120_p6, %p119_p4  ;;  %p45_p8 = scmp.ge.s32.totalorder %s1963_s10, 2 }
  0x20   : > { %s103_s16 = sor.u32 %s102_s12, %s101_s14  ;;  %s188_s17 = sadd.s32 1, %s1378_s20 }
  0x21   : > { %p104_p9 = scmp.eq.s32.totalorder %s103_s16, 0  ;;  %s1965_s10 = smov (%p45_p8, %s1963_s10), 0 }
  0x22   : > { %1915 = sst [smem:[#allocation21_spill]] %s1965_s10  ;;  %s185_s7 = ssub.s32 %s1414_s29, %s1965_s10 }
  0x23   : > { %s1562_s21 = scalar_select %p104_p9, %s1390_s23, %s106_s11  }
  0x24   : > { %p198_p10 = scmp.ne.s32.totalorder %s1378_s20, %s1374_s19  ;;  %p186_p11 = scmp.eq.s32.totalorder %s185_s7, 0 }
  0x25   : > { %1916 = sst [smem:[#allocation22_spill]] %s1562_s21  ;;  %p199_p12 = scmp.eq.s32.totalorder %s1527_s6, 31 }
  0x26   : > { %p204_p13 = scmp.ne.s32.totalorder %s1374_s19, %s1370_s18  ;;  %s1917_s9 = sadd.s32 4294967294, %s1418_s30  }
  0x27   : > { %p205_p0 = scmp.eq.s32.totalorder %s1917_s9, 31  ;;  %p1576_p1 = por %p199_p12, %p198_p10 }
  0x28   : > { %s1574_s12 = scalar_select %p186_p11, %s1378_s20, %s188_s17  }
  0x29   : > { %s1919_s14 = scalar_select %p1576_p1, 1, 0 }
  0x2a   : > { %1918 = sst [smem:[#allocation23_spill]] %s1574_s12  ;;  %p1580_p2 = por %p205_p0, %p204_p13 }
  0x2b   : > { %1920 = sst [smem:[#allocation24_spill]] %s1919_s14  ;;  %p1076_p3 = scmp.lt.s32.totalorder %s1418_s30, 32 }
  0x2c   : > { %s1921_s11 = scalar_select %p1580_p2, 1, 0 }
  0x2d   : > { %s1890_s16 = sand.u32 1, %s1390_s23   ;;  %s1893_s10 = sshll.u32 %s1410_s28, 5 }
  0x2e   : > { %1922 = sst [smem:[#allocation25_spill]] %s1921_s11  ;;  %s1589_s7 = sshll.u32 %s1890_s16, 7 }
  0x2f   : > { %s1594_s9 = sadd.s32 %s1406_s27, %s1893_s10  ;;  %p1599_p4 = pnand %p1076_p3, %p1544_p5 }
  0x30   : > { %s877_s17 = sshll.u32 %s1594_s9, 7  ;;  %s265_s29 = sand.u32 1, %s1418_s30  }
  0x31   : > { %s1924_s3 = sld [smem:[#allocation29_spill]]  ;;  %s269_s20 = scalar_lea.vmem [#allocation6], %s1589_s7 }
  0x32   : > { %s277_s11 = sshll.u32 %s269_s20, 4  ;;  %p885_p6 = scmp.ge.s32.totalorder %s1418_s30, 1  ;;  %s278_s11 = int_to_ptr.vmem [resolvable:$true] %s277_s11 }
  0x33   : > { %p308_p8 = scmp.lt.s32.totalorder %s1418_s30, 33  ;;  %s1612_s10 = scalar_lea.sflag [#allocation7], %s265_s29 }
  0x34   : > { %p1196_p5 = pneg %p1599_p4  ;;  %s1207_s13 = scalar_lea.vmem %s278_s11, 2048 }
  0x35   : > { %p1208_p9 = scmp.ne.s32.totalorder %s278_s11, %s1207_s13  ;;  %s1420_s18 = smov [#allocation6]  }
  0x36   : > { %s1212_s5 = sshll.u32 %s1420_s18, 4  ;;  %s1213_s5 = int_to_ptr.vmem [resolvable:$false] %s1212_s5 }
  0x37   : > { %s276_s16 = scalar_lea.hbm %s1924_s3, %s877_s17  ;;  %p1210_p10 = pnand %p1208_p9, %p1196_p5 }
  0x38   : > { %s1214_s21 = scalar_lea.vmem %s1213_s5, 4096  ;;  %p1215_p12 = scmp.lt.s32.totalorder %s278_s11, %s1213_s5 }
  0x39   : > { %p1211_p11 = pneg %p1210_p10  ;;  %p1216_p13 = scmp.lt.s32.totalorder %s1214_s21, %s1207_s13 }
  0x3b   : > { %p1217_p0 = por %p1216_p13, %p1215_p12 }
  0x3d   : > { %p1218_p3 = pnand %p1217_p0, %p1211_p11 }
  0x3f   : > { %1221 = shalt.err (!%p1218_p3)
}
  0x40   : > { %s1421_s20 = smov 256   ;;  %s1422_s29 = smov 128  }
  0x41   : > { %s1423_s12 = smov 8   ;;  %p1628_p9 = pnand %p885_p6, %p308_p8 }
  0x42   : > { %1068 = dma.hbm_to_vmem [thread:$0]  (!%p1599_p4), %s276_s16, 2048, %s278_s11, %s1612_s10, %s1421_s20, %s1422_s29, %s1423_s12  }
  0x43   : > { %s1926_s2 = sld [smem:[#allocation28_spill]]  ;;  %s247_s3 = scalar_lea.vmem [#allocation3], %s1589_s7 }
  0x44   : > { %s255_s14 = sshll.u32 %s247_s3, 4  ;;  %s882_s1 = sshll.u32 %s1406_s27, 4  ;;  %s256_s14 = int_to_ptr.vmem [resolvable:$true] %s255_s14 }
  0x45   : > { %s1927_s0 = sand.u32 1, %s1390_s23   ;;  %s1235_s25 = scalar_lea.vmem %s256_s14, 2048 }
  0x46   : > { %s244_s24 = scalar_lea.sflag [#allocation4], %s1927_s0  ;;  %p1236_p10 = scmp.ne.s32.totalorder %s256_s14, %s1235_s25 }
  0x47   : > { %s1424_s11 = smov [#allocation3]  }
  0x48   : > { %p1238_p11 = pnand %p1236_p10, %p1196_p5  ;;  %s1240_s16 = sshll.u32 %s1424_s11, 4  ;;  %s1241_s16 = int_to_ptr.vmem [resolvable:$false] %s1240_s16 }
  0x49   : > { %s254_s21 = scalar_lea.hbm %s1926_s2, %s877_s17  ;;  %s1242_s9 = scalar_lea.vmem %s1241_s16, 4096 }
  0x4a   : > { %p1239_p6 = pneg %p1238_p11  ;;  %p1243_p8 = scmp.lt.s32.totalorder %s256_s14, %s1241_s16 }
  0x4b   : > { %p1244_p12 = scmp.lt.s32.totalorder %s1242_s9, %s1235_s25 }
  0x4d   : > { %p1245_p13 = por %p1244_p12, %p1243_p8 }
  0x4f   : > { %p1246_p0 = pnand %p1245_p13, %p1239_p6 }
  0x51   : > { %1249 = shalt.err (!%p1246_p0)
}
  0x52   : > { %1065 = dma.hbm_to_vmem [thread:$0]  (!%p1599_p4), %s254_s21, 2048, %s256_s14, %s244_s24, %s1421_s20, %s1422_s29, %s1423_s12  }
  0x53   : > { %s1928_s0 = sshll.u32 %s1410_s28, 5  ;;  %s291_s17 = scalar_lea.vmem [#allocation8], %s1589_s7 }
  0x54   : > { %s297_s3 = sadd.s32 %s882_s1, %s1928_s0  ;;  %s300_s18 = sshll.u32 %s291_s17, 4  ;;  %s301_s18 = int_to_ptr.vmem [resolvable:$true] %s300_s18 }
  0x55   : > { %s884_s13 = sshll.u32 %s297_s3, 7  ;;  %s1263_s9 = scalar_lea.vmem %s301_s18, 2048 }
  0x56   : > { %s299_s25 = scalar_lea.hbm %s1884_s4, %s884_s13  ;;  %p1264_p3 = scmp.ne.s32.totalorder %s301_s18, %s1263_s9 }
  0x57   : > { %s1425_s2 = smov [#allocation8]  }
  0x58   : > { %p1266_p10 = pnand %p1264_p3, %p1196_p5  ;;  %s1268_s27 = sshll.u32 %s1425_s2, 4  ;;  %s1269_s27 = int_to_ptr.vmem [resolvable:$false] %s1268_s27 }
  0x59   : > { %s1270_s24 = scalar_lea.vmem %s1269_s27, 4096  ;;  %p1271_p6 = scmp.lt.s32.totalorder %s301_s18, %s1269_s27 }
  0x5a   : > { %p1267_p11 = pneg %p1266_p10  ;;  %p1272_p8 = scmp.lt.s32.totalorder %s1270_s24, %s1263_s9 }
  0x5c   : > { %p1273_p12 = por %p1272_p8, %p1271_p6 }
  0x5e   : > { %p1274_p13 = pnand %p1273_p12, %p1267_p11 }
  0x60   : > { %1277 = shalt.err (!%p1274_p13)
}
  0x61   : > { %1071 = dma.hbm_to_vmem [thread:$0]  (!%p1599_p4), %s299_s25, 2048, %s301_s18, %s1612_s10, %s1422_s29, %s1422_s29, %s1423_s12  }
  0x62   : > { %312 = sbr.rel (%p1628_p9) target bundleno = 616 (0x268), region = 40  ;;  %s314_s1 = sand.u32 (!%p1628_p9), 1, %s1386_s22  }
  0x63   : > { %s886_s2 = sshll.u32 (!%p1628_p9), %s314_s1, 7  ;;  %s315_s14 = scalar_lea.sflag (!%p1628_p9), [#allocation4], %s314_s1 }
  0x64   : > { %s1666_s27 = scalar_lea.vmem (!%p1628_p9), [#allocation3], %s886_s2 }
  0x67   : > { %1357 = dma.done.wait (%p1554_p7), %s315_s14, 2048  }
  0x68   : > { %1359 = vsyncadd (%p1554_p7), %s315_s14, 4294965248  ;;  %s323_s8 = sand.u32 1, %s1527_s6   ;;  %s1673_s10 = scalar_lea.vmem [#allocation6], %s886_s2 }
  0x69   : > { %s324_s7 = scalar_lea.sflag [#allocation7], %s323_s8 }
  0x6a   : > { %1361 = dma.done.wait (%p1554_p7), %s324_s7, 4096  }
  0x6b   : > { %1363 = vsyncadd (%p1554_p7), %s324_s7, 4294963200  ;;  %s1929_s20 = sld [smem:[#allocation16_spill]]  ;;  %s382_s12 = sand.u32 1, %s1374_s19  }
  0x6c   : > { %s1930_s29 = sld [smem:[#allocation15_spill]]  ;;  %s1682_s5 = sshll.u32 %s382_s12, 3 }
  0x6d   : > { %p385_p4 = scmp.lt.s32.totalorder %s1402_s26, 1  ;;  %s1931_s17 = sld [smem:[#allocation26_spill]] }
  0x6e   : > { %s1932_s24 = sld [smem:[#allocation27_spill]]  ;;  %s1700_s14 = scalar_lea.vmem [#allocation8], %s886_s2 }
  0x6f   : > { %s386_s6 = scalar_select %p385_p4, %s1402_s26, 1 }
  0x70   : > { %s384_s8 = scalar_lea.vmem [#allocation9], %s1682_s5 }
  0x71   : > { %p389_p5 = scmp.lt.s32.totalorder %s1929_s20, 7  ;;  %s890_s0 = sshll.u32 %s386_s6, 3 }
  0x72   : > { %p398_p9 = scmp.eq.s32.totalorder %s1929_s20, 0  ;;  %p399_p7 = scmp.eq.s32.totalorder %s1930_s29, 0 }
  0x73   : > { %s390_s21 = scalar_select %p389_p5, %s1929_s20, 7 }
  0x74   : > { %s1692_s18 = scalar_lea.vmem %s1931_s17, %s890_s0  ;;  %p400_p0 = pnand %p399_p7, %p398_p9 }
  0x75   : > { %s891_s13 = sshll.u32 %s390_s21, 1 }
  0x76   : > { %s394_s11 = sadd.s32 %s891_s13, %s386_s6  ;;  %403 = sbr.rel (%p400_p0) target bundleno = 125 (0x7d), region = 56 }
  0x77   : > { %s892_s16 = sshll.u32 %s394_s11, 3 }
  0x78   : > { %s1698_s1 = scalar_lea.vmem %s1932_s24, %s892_s16 }
  0x7b   : > { %v1426_v0 = vmov 0.0  }
  0x7c   : > { %404 = vst [vmem:[#allocation2] sm:$0xff] %v1426_v0 }
  0x7d PF: > { %v421_v1 = vld [vmem:[%s1666_s27 + $0x78] sm:$0xff]  ;;  %v1427_v2 = vmov 0.0   ;;  %v420_v3 = vld [vmem:[%s1666_s27 + $0x70] sm:$0xff]  ;;  %vm1428_vm0 = vmmov 0   ;;  %v419_v4 = vld [vmem:[%s1666_s27 + $0x68] sm:$0xff]  ;;  %v1429_v5 = vmov 0  }
  0x7e   : > { %949 = vmatprep.subr.mxu0 %v1427_v2  ;;  %981 = vmatprep.mubr.msk.f32.mxu0 %vm1428_vm0, %v1427_v2  ;;  %v418_v6 = vld [vmem:[%s1666_s27 + $0x60] sm:$0xff]  ;;  %v507_v7 = vld [vmem:[%s1673_s10 + $0x78] sm:$0xff]  ;;  %v506_v8 = vld [vmem:[%s1673_s10 + $0x70] sm:$0xff]  ;;  %s1933_s2 = sld [smem:[#allocation16_spill]] }
  0x7f   : > { %950 = vmatpush3.msra.mxu0 %v421_v1  ;;  %984 = vmatprep.subr.mxu1 %v1427_v2  ;;  %v417_v9 = vld [vmem:[%s1666_s27 + $0x58] sm:$0xff]  ;;  %v505_v10 = vld [vmem:[%s1673_s10 + $0x68] sm:$0xff]  ;;  %v416_v11 = vld [vmem:[%s1666_s27 + $0x50] sm:$0xff] }
  0x80   : > { %951 = vmatprep.subr.mxu0 %v1427_v2  ;;  %1016 = vmatprep.mubr.msk.f32.mxu1 %vm1428_vm0, %v1427_v2  ;;  %v504_v12 = vld [vmem:[%s1673_s10 + $0x60] sm:$0xff]  ;;  %v415_v13 = vld [vmem:[%s1666_s27 + $0x48] sm:$0xff]  ;;  %v503_v14 = vld [vmem:[%s1673_s10 + $0x58] sm:$0xff] }
  0x81   : > { %952 = vmatpush3.msra.mxu0 %v420_v3  ;;  %1189 = vset.pattern.permute.xlu0 %v1429_v5  ;;  %v414_v15 = vld [vmem:[%s1666_s27 + $0x40] sm:$0xff]  ;;  %v502_v16 = vld [vmem:[%s1673_s10 + $0x50] sm:$0xff]  ;;  %v413_v17 = vld [vmem:[%s1666_s27 + $0x38] sm:$0xff] }
  0x82   : > { %953 = vmatprep.subr.mxu0 %v1427_v2  ;;  %985 = vmatpush3.msra.mxu1 %v507_v7  ;;  %v501_v18 = vld [vmem:[%s1673_s10 + $0x48] sm:$0xff]  ;;  %v412_v19 = vld [vmem:[%s1666_s27 + $0x30] sm:$0xff]  ;;  %v500_v20 = vld [vmem:[%s1673_s10 + $0x40] sm:$0xff] }
  0x83   : > { %954 = vmatpush3.msra.mxu0 %v419_v4  ;;  %986 = vmatprep.subr.mxu1 %v1427_v2  ;;  %v411_v21 = vld [vmem:[%s1666_s27 + $0x28] sm:$0xff]  ;;  %v499_v22 = vld [vmem:[%s1673_s10 + $0x38] sm:$0xff]  ;;  %v410_v23 = vld [vmem:[%s1666_s27 + $0x20] sm:$0xff] }
  0x84   : > { %955 = vmatprep.subr.mxu0 %v1427_v2  ;;  %987 = vmatpush3.msra.mxu1 %v506_v8  ;;  %v498_v24 = vld [vmem:[%s1673_s10 + $0x30] sm:$0xff]  ;;  %v409_v25 = vld [vmem:[%s1666_s27 + $0x18] sm:$0xff]  ;;  %v497_v26 = vld [vmem:[%s1673_s10 + $0x28] sm:$0xff]  ;;  %p682_p3 = scmp.eq.s32.totalorder %s1933_s2, 7 }
  0x85   : > { %956 = vmatpush3.msra.mxu0 %v418_v6  ;;  %988 = vmatprep.subr.mxu1 %v1427_v2  ;;  %v408_v27 = vld [vmem:[%s1666_s27 + $0x10] sm:$0xff]  ;;  %v496_v28 = vld [vmem:[%s1673_s10 + $0x20] sm:$0xff]  ;;  %v407_v29 = vld [vmem:[%s1666_s27 + $0x8] sm:$0xff] }
  0x86   : > { %957 = vmatprep.subr.mxu0 %v1427_v2  ;;  %989 = vmatpush3.msra.mxu1 %v505_v10  ;;  %v495_v30 = vld [vmem:[%s1673_s10 + $0x18] sm:$0xff]  ;;  %v406_v31 = vld [vmem:[%s1666_s27] sm:$0xff]  ;;  %v494_v32 = vld [vmem:[%s1673_s10 + $0x10] sm:$0xff]  ;;  %s1934_s27 = sld [smem:[#allocation15_spill]] }
  0x87   : > { %958 = vmatpush3.msra.mxu0 %v417_v9  ;;  %990 = vmatprep.subr.mxu1 %v1427_v2  ;;  %v405_v33 = vld [vmem:[%s1692_s18] sm:$0xff]  ;;  %v493_v34 = vld [vmem:[%s1673_s10 + $0x8] sm:$0xff]  ;;  %v492_v36 = vld [vmem:[%s1673_s10] sm:$0xff] }
  0x88   : > { %959 = vmatprep.subr.mxu0 %v1427_v2  ;;  %991 = vmatpush3.msra.mxu1 %v504_v12  ;;  %v586_v35 = vld [vmem:[%s1698_s1] sm:$0xff]  ;;  %v607_v38 = vld [vmem:[%s1700_s14 + $0x70] sm:$0xff]  ;;  %v606_v39 = vld [vmem:[%s1700_s14 + $0x68] sm:$0xff] }
  0x89   : > { %960 = vmatpush3.msra.mxu0 %v416_v11  ;;  %992 = vmatprep.subr.mxu1 %v1427_v2  ;;  %v608_v37 = vld [vmem:[%s1700_s14 + $0x78] sm:$0xff]  ;;  %v605_v40 = vld [vmem:[%s1700_s14 + $0x60] sm:$0xff]  ;;  %v603_v42 = vld [vmem:[%s1700_s14 + $0x50] sm:$0xff] }
  0x8a   : > { %961 = vmatprep.subr.mxu0 %v1427_v2  ;;  %993 = vmatpush3.msra.mxu1 %v503_v14  ;;  %v604_v41 = vld [vmem:[%s1700_s14 + $0x58] sm:$0xff]  ;;  %v602_v43 = vld [vmem:[%s1700_s14 + $0x48] sm:$0xff]  ;;  %v601_v44 = vld [vmem:[%s1700_s14 + $0x40] sm:$0xff] }
  0x8b   : > { %962 = vmatpush3.msra.mxu0 %v415_v13  ;;  %994 = vmatprep.subr.mxu1 %v1427_v2  ;;  %v600_v45 = vld [vmem:[%s1700_s14 + $0x38] sm:$0xff]  ;;  %v599_v46 = vld [vmem:[%s1700_s14 + $0x30] sm:$0xff]  ;;  %v598_v47 = vld [vmem:[%s1700_s14 + $0x28] sm:$0xff] }
  0x8c   : > { %963 = vmatprep.subr.mxu0 %v1427_v2  ;;  %995 = vmatpush3.msra.mxu1 %v502_v16  ;;  %v597_v48 = vld [vmem:[%s1700_s14 + $0x20] sm:$0xff]  ;;  %v596_v49 = vld [vmem:[%s1700_s14 + $0x18] sm:$0xff]  ;;  %v595_v50 = vld [vmem:[%s1700_s14 + $0x10] sm:$0xff]  ;;  %p683_p10 = scmp.eq.s32.totalorder %s1934_s27, 1 }
  0x8d   : > { %964 = vmatpush3.msra.mxu0 %v414_v15  ;;  %996 = vmatprep.subr.mxu1 %v1427_v2  ;;  %v594_v51 = vld [vmem:[%s1700_s14 + $0x8] sm:$0xff]  ;;  %v593_v52 = vld [vmem:[%s1700_s14] sm:$0xff]  ;;  %v679_v1 = vld [vmem:[#allocation2] sm:$0xff] }
  0x8e   : > { %965 = vmatprep.subr.mxu0 %v1427_v2  ;;  %997 = vmatpush3.msra.mxu1 %v501_v18  ;;  %p684_p11 = pnand %p683_p10, %p682_p3 }
  0x8f   : > { %966 = vmatpush3.msra.mxu0 %v413_v17  ;;  %998 = vmatprep.subr.mxu1 %v1427_v2 }
  0x90   : > { %967 = vmatprep.subr.mxu0 %v1427_v2  ;;  %999 = vmatpush3.msra.mxu1 %v500_v20 }
  0x91   : > { %968 = vmatpush3.msra.mxu0 %v412_v19  ;;  %1000 = vmatprep.subr.mxu1 %v1427_v2 }
  0x92   : > { %969 = vmatprep.subr.mxu0 %v1427_v2  ;;  %1001 = vmatpush3.msra.mxu1 %v499_v22 }
  0x93   : > { %970 = vmatpush3.msra.mxu0 %v411_v21  ;;  %1002 = vmatprep.subr.mxu1 %v1427_v2 }
  0x94   : > { %971 = vmatprep.subr.mxu0 %v1427_v2  ;;  %1003 = vmatpush3.msra.mxu1 %v498_v24 }
  0x95   : > { %972 = vmatpush3.msra.mxu0 %v410_v23  ;;  %1004 = vmatprep.subr.mxu1 %v1427_v2 }
  0x96   : > { %973 = vmatprep.subr.mxu0 %v1427_v2  ;;  %1005 = vmatpush3.msra.mxu1 %v497_v26 }
  0x97   : > { %974 = vmatpush3.msra.mxu0 %v409_v25  ;;  %1006 = vmatprep.subr.mxu1 %v1427_v2 }
  0x98   : > { %975 = vmatprep.subr.mxu0 %v1427_v2  ;;  %1007 = vmatpush3.msra.mxu1 %v496_v28 }
  0x99   : > { %976 = vmatpush3.msra.mxu0 %v408_v27  ;;  %1008 = vmatprep.subr.mxu1 %v1427_v2 }
  0x9a   : > { %977 = vmatprep.subr.mxu0 %v1427_v2  ;;  %1009 = vmatpush3.msra.mxu1 %v495_v30 }
  0x9b   : > { %978 = vmatpush3.msra.mxu0 %v407_v29  ;;  %1010 = vmatprep.subr.mxu1 %v1427_v2 }
  0x9c   : > { %979 = vmatprep.subr.mxu0 %v1427_v2  ;;  %1011 = vmatpush3.msra.mxu1 %v494_v32 }
  0x9d   : > { %980 = vmatpush3.msra.mxu0 %v406_v31  ;;  %1012 = vmatprep.subr.mxu1 %v1427_v2 }
  0x9e   : > { %982 = vmatmul.mubr.f32.vlgmr.msra.gmra.mxu0 %v405_v33  ;;  %1013 = vmatpush3.msra.mxu1 %v493_v34 }
  0x9f   : > { %589 = vperm.xlu0 %1189, %v586_v35   ;;  %1014 = vmatprep.subr.mxu1 %v1427_v2 }
  0xa0   : > { %1019 = vmatprep.subr.mxu0 %v1427_v2  ;;  %1015 = vmatpush3.msra.mxu1 %v492_v36 }
  0xa1   : > { %1051 = vmatprep.mubr.msk.f32.mxu0 %vm1428_vm0, %v1427_v2  ;;  %1017 = vmatmul.mubr.f32.vlgmr.msra.gmra.mxu1 %v405_v33 }
  0xa2   : > { %1020 = vmatpush3.msra.mxu0 %v608_v37 }
  0xa3   : > { %1021 = vmatprep.subr.mxu0 %v1427_v2 }
  0xa4   : > { %1022 = vmatpush3.msra.mxu0 %v607_v38 }
  0xa5   : > { %1023 = vmatprep.subr.mxu0 %v1427_v2 }
  0xa6   : > { %1024 = vmatpush3.msra.mxu0 %v606_v39 }
  0xa7   : > { %1025 = vmatprep.subr.mxu0 %v1427_v2 }
  0xa8   : > { %1026 = vmatpush3.msra.mxu0 %v605_v40 }
  0xa9   : > { %1027 = vmatprep.subr.mxu0 %v1427_v2 }
  0xaa   : > { %1028 = vmatpush3.msra.mxu0 %v604_v41 }
  0xab   : > { %1029 = vmatprep.subr.mxu0 %v1427_v2 }
  0xac   : > { %1030 = vmatpush3.msra.mxu0 %v603_v42 }
  0xad   : > { %1031 = vmatprep.subr.mxu0 %v1427_v2 }
  0xae   : > { %1032 = vmatpush3.msra.mxu0 %v602_v43 }
  0xaf   : > { %1033 = vmatprep.subr.mxu0 %v1427_v2 }
  0xb0   : > { %1034 = vmatpush3.msra.mxu0 %v601_v44 }
  0xb1   : > { %1035 = vmatprep.subr.mxu0 %v1427_v2 }
  0xb2   : > { %1036 = vmatpush3.msra.mxu0 %v600_v45 }
  0xb3   : > { %1037 = vmatprep.subr.mxu0 %v1427_v2 }
  0xb4   : > { %1038 = vmatpush3.msra.mxu0 %v599_v46 }
  0xb5   : > { %1039 = vmatprep.subr.mxu0 %v1427_v2 }
  0xb6   : > { %1040 = vmatpush3.msra.mxu0 %v598_v47 }
  0xb7   : > { %1041 = vmatprep.subr.mxu0 %v1427_v2 }
  0xb8   : > { %1042 = vmatpush3.msra.mxu0 %v597_v48 }
  0xb9   : > { %1043 = vmatprep.subr.mxu0 %v1427_v2 }
  0xba   : > { %1044 = vmatpush3.msra.mxu0 %v596_v49 }
  0xbb   : > { %1045 = vmatprep.subr.mxu0 %v1427_v2 }
  0xbc   : > { %1046 = vmatpush3.msra.mxu0 %v595_v50 }
  0xbd   : > { %1047 = vmatprep.subr.mxu0 %v1427_v2 }
  0xbe   : > { %1048 = vmatpush3.msra.mxu0 %v594_v51 }
  0xbf   : > { %1049 = vmatprep.subr.mxu0 %v1427_v2 }
  0xc0   : > { %1050 = vmatpush3.msra.mxu0 %v593_v52 }
 0x11a   : > { %v590_v62 = vpop.permute.xlu0 %589 }
 0x15e   : > { %v488_v53 = vpop.f32.mrf.mxu0 }
 0x15f   : > { %v893_v54 = vmul.f32 -1.442695, %v488_v53 }
 0x160   : > { %v983_v55 = vpop.f32.mrf.mxu0 }
 0x161   : > { %1190 = vpow2.f32 %v893_v54  ;;  %v574_v56 = vpop.f32.mrf.mxu1 }
 0x163   : > { %v1018_v57 = vpop.f32.mrf.mxu1 }
 0x16e   : > { %v1191_v58 = vpop.eup %1190 }
 0x16f   : > { %v581_v59 = vadd.f32 1.0, %v1191_v58 }
 0x171   : > { %1192 = vrcp.f32 %v581_v59 }
 0x17e   : > { %v1193_v60 = vpop.eup %1192 }
 0x17f   : > { %v584_v61 = vmul.f32 %v1193_v60, %v488_v53 }
 0x181   : > { %v585_v63 = vmul.f32 %v584_v61, %v574_v56 }
 0x183   : > { %v592_v0 = vmul.f32 %v590_v62, %v585_v63 }
 0x185   : > { %1052 = vmatmul.mubr.f32.vlgmr.msra.gmra.mxu0 %v592_v0 }
 0x244   : > { %687 = sbr.rel (%p684_p11) target bundleno = 593 (0x251), region = 60 }
 0x245   : > { %v675_v2 = vpop.f32.mrf.mxu0 }
 0x246   : > { %v680_v3 = vadd.f32 %v679_v1, %v675_v2 }
 0x247   : > { %v1053_v4 = vpop.f32.mrf.mxu0 }
 0x248   : > { %681 = vst [vmem:[#allocation2] sm:$0xff] %v680_v3 }
 0x24f   : > { %v688_v5 = vld [vmem:[#allocation2] sm:$0xff] }
 0x250   : > { %689 = vst [vmem:[%s384_s8] sm:$0xff] %v688_v5 }
 0x251 PF: > { %s895_s10 = sshll.u32 %s1402_s26, 7  ;;  %s1936_s6 = sld [smem:[#allocation30_spill]] }
 0x252   : > { %s704_s0 = sshll.u32 %s384_s8, 4  ;;  %s691_s15 = scalar_lea.sflag [#allocation5], %s382_s12  ;;  %s705_s0 = int_to_ptr.vmem [resolvable:$true] %s704_s0 }
 0x253   : > { %s1278_s3 = scalar_lea.vmem %s705_s0, 128  ;;  %s1430_s17 = smov [#allocation9]  }
 0x254   : > { %p1279_p6 = scmp.ne.s32.totalorder %s705_s0, %s1278_s3  ;;  %s1282_s18 = sshll.u32 %s1430_s17, 4  ;;  %s1283_s18 = int_to_ptr.vmem [resolvable:$false] %s1282_s18 }
 0x255   : > { %s1284_s13 = scalar_lea.vmem %s1283_s18, 256  ;;  %p1285_p13 = scmp.lt.s32.totalorder %s705_s0, %s1283_s18 }
 0x256   : > { %p1280_p8 = pnand %p1279_p6, %p1576_p1  ;;  %p1286_p4 = scmp.lt.s32.totalorder %s1284_s13, %s1278_s3 }
 0x257   : > { %s702_s21 = scalar_lea.hbm %s1936_s6, %s895_s10 }
 0x258   : > { %p1281_p12 = pneg %p1280_p8  ;;  %p1287_p5 = por %p1286_p4, %p1285_p13 }
 0x25a   : > { %p1288_p9 = pnand %p1287_p5, %p1281_p12 }
 0x25c   : > { %1291 = shalt.err (!%p1288_p9)
}
 0x25d   : > { %s1292_s26 = scalar_lea.hbm %s702_s21, 128  ;;  %s1296_s11 = scalar_lea.hbm %s1936_s6, 256 }
 0x25e   : > { %p1293_p7 = scmp.ne.s32.totalorder %s702_s21, %s1292_s26  ;;  %p1297_p10 = scmp.lt.s32.totalorder %s702_s21, %s1936_s6 }
 0x25f   : > { %p1298_p11 = scmp.lt.s32.totalorder %s1296_s11, %s1292_s26 }
 0x260   : > { %p1294_p0 = pnand %p1293_p7, %p1576_p1 }
 0x261   : > { %p1299_p6 = por %p1298_p11, %p1297_p10 }
 0x262   : > { %p1295_p3 = pneg %p1294_p0 }
 0x264   : > { %p1300_p8 = pnand %p1299_p6, %p1295_p3 }
 0x266   : > { %1303 = shalt.err (!%p1300_p8)
}
 0x267   : > { %1060 = dma.vmem_to_hbm [thread:$0]  (%p1576_p1), %s705_s0, 128, %s702_s21, %s691_s15  }
 0x268 PF: > { %s1937_s9 = sld [smem:[#allocation13_spill]]  ;;  %p1077_p12 = scmp.ge.s32.totalorder %s1418_s30, 2 }
 0x26a   : > { %p1073_p13 = pnand %p1077_p12, %p1580_p2 }
 0x26c   : > { %p1074_p4 = pneg %p1073_p13 }
 0x26e   : > { %s716_s1 = sand.u32 1, %s1937_s9  }
 0x26f   : > { %s717_s14 = scalar_lea.sflag [#allocation5], %s716_s1 }
 0x270   : > { %1365 = dma.done.wait (%p1074_p4), %s717_s14, 128  }
 0x271   : > { %1367 = vsyncadd (%p1074_p4), %s717_s14, 4294967168  ;;  %s24_s30 = sadd.s32 1, %s1418_s30   ;;  %s1940_s2 = sld [smem:[#allocation14_spill]] }
 0x272   : > { %p1836_p5 = scmp.ge.s32.totalorder %s24_s30, 34   ;;  %s1941_s20 = sld [smem:[#allocation23_spill]] }
 0x273   : > { %s1942_s27 = sld [smem:[#allocation22_spill]]  ;;  %s1948_s18 = smov %s1374_s19 }
 0x274   : > { %s1943_s24 = sld [smem:[#allocation17_spill]]  ;;  %s1950_s21 = smov %s1386_s22 }
 0x275   : > { %s1944_s26 = sld [smem:[#allocation18_spill]]  ;;  %s1951_s22 = smov %s1390_s23 }
 0x276   : > { %s1945_s7 = sld [smem:[#allocation19_spill]]  ;;  %s1953_s25 = smov %s1410_s28 }
 0x277   : > { %s1946_s10 = sld [smem:[#allocation20_spill]]  ;;  %s1949_s19 = smov %s1940_s2 }
 0x278   : > { %s1947_s29 = sld [smem:[#allocation21_spill]] }
 0x279   : > { %s1952_s23 = smov %s1942_s27  ;;  %23 = sbr.rel (!%p1836_p5) target bundleno = 18 (0x12), region = 123 }
 0x27c   : > { %s1954_s27 = smov %s1945_s7 }
 0x27d   : > { %s1955_s28 = smov %s1946_s10 }
 0x27e   :  { %722 = vsyncpa [#allocation4], 1 }
 0x27f   :  { %724 = vsyncpa [#allocation4 + $0x1], 1 }
 0x280   :  { %725 = vsyncpa [#allocation7], 1 }
 0x281   :  { %727 = vsyncpa [#allocation7 + $0x1], 1 }
 0x282   :  { %728 = vsyncpa [#allocation5], 1 }
 0x283   :  { %730 = vsyncpa [#allocation5 + $0x1], 1 }

</bundles_post_ra>
